<compile_context>
chip_gen: v7x
topology: tpu7x:2x2x1
jax: 0.10.0
libtpu: 0.0.40
codegen_flags: <defaults>
</compile_context>

<pallas_src>
import jax
import jax.numpy as jnp
from jax.experimental import pallas as pl
from jax.experimental.pallas import tpu as pltpu


def _round_up(n, m):
    return ((n + m - 1) // m) * m


def _diag_gaussian_equi_kernel(x_ref, o_ref):
    # x_ref / o_ref: (4, TB) with batch on the lane axis.
    # rows 0..1 -> tanh(x)            (mean)
    # rows 2..3 -> exp(tanh(x))       (scale)
    t = jnp.tanh(x_ref[...])                                   # VPU/EUP
    row = jax.lax.broadcasted_iota(jnp.int32, t.shape, 0)
    # exp on all rows + select keeps the store a single dense (4, TB) tile;
    # exp runs on the otherwise-idle EUP slot, the kernel stays HBM-bound.
    o_ref[...] = jnp.where(row < 2, t, jnp.exp(t))


def diag_gaussian_equi(x, *, max_tile=2048):
    """Returns (mean, scale) of the FixedNormal produced by DiagGaussianEqui."""
    B, F = x.shape
    assert F == 4, "DiagGaussianEqui expects 4 features: 2 mean + 2 log-ish std"

    orig_dtype = x.dtype
    compute_dtype = jnp.float32 if orig_dtype == jnp.bfloat16 else orig_dtype

    # Lane-dense layout: batch on the last (lane) axis.
    xt = x.astype(compute_dtype).T                             # (4, B)

    # Batch tile: multiple of 128 lanes, capped for VMEM headroom (well under
    # the 64 MiB v7x VMEM even double-buffered: 4 * 2048 * 4 B = 32 KiB/buf).
    TB = min(max_tile, _round_up(B, 128))
    B_pad = _round_up(B, TB)
    if B_pad != B:
        xt = jnp.pad(xt, ((0, 0), (0, B_pad - B)))

    out = pl.pallas_call(
        _diag_gaussian_equi_kernel,
        out_shape=jax.ShapeDtypeStruct((F, B_pad), compute_dtype),
        grid_spec=pltpu.PrefetchScalarGridSpec(
            num_scalar_prefetch=0,
            grid=(B_pad // TB,),
            # Sublane dim (4) equals the full array dim -> exempt from the
            # (8, 128) rule; lane dim TB is a multiple of 128.
            in_specs=[pl.BlockSpec((F, TB), lambda i: (0, i))],
            out_specs=pl.BlockSpec((F, TB), lambda i: (0, i)),
        ),
        compiler_params=pltpu.CompilerParams(
            dimension_semantics=("parallel",),   # shards tiles across v7x TCs
        ),
    )(xt)

    out = out[:, :B]                                           # drop padding
    mean = out[:2, :].T.astype(orig_dtype)                     # (B, 2)
    scale = out[2:, :].T.astype(orig_dtype)                    # (B, 2)
    return mean, scale


# Convenience helpers mirroring FixedNormal (plain JAX glue, not hot path).
def fixed_normal_log_probs(mean, scale, actions):
    var = scale * scale
    lp = (-((actions - mean) ** 2) / (2.0 * var)
          - jnp.log(scale) - 0.5 * jnp.log(2.0 * jnp.pi))
    return lp.sum(-1, keepdims=True)


def fixed_normal_mode(mean, scale):
    return mean


if __name__ == "__main__":
    key = jax.random.PRNGKey(0)
    B = 8  # small RL-style batch
    x = jax.random.normal(key, (B, 4), dtype=jnp.float32)

    mean, scale = diag_gaussian_equi(x)
    jax.block_until_ready((mean, scale))

    # Reference check in plain JAX.
    t = jnp.tanh(x)
    ref_mean = t[:, :2]
    ref_scale = jnp.exp(t[:, 2:])
    assert jnp.allclose(mean, ref_mean, atol=1e-6), "mean mismatch"
    assert jnp.allclose(scale, ref_scale, atol=1e-6), "scale mismatch"

    # Also check a larger, non-multiple-of-128 batch to exercise tiling/padding.
    B2 = 300
    x2 = jax.random.normal(jax.random.PRNGKey(2), (B2, 4), dtype=jnp.float32)
    mean2, scale2 = diag_gaussian_equi(x2)
    jax.block_until_ready((mean2, scale2))
    t2 = jnp.tanh(x2)
    assert jnp.allclose(mean2, t2[:, :2], atol=1e-6)
    assert jnp.allclose(scale2, jnp.exp(t2[:, 2:]), atol=1e-6)

    # Exercise the FixedNormal helpers once (mode / log_probs).
    actions = jax.random.normal(jax.random.PRNGKey(1), (B, 2), dtype=jnp.float32)
    _ = jax.block_until_ready(fixed_normal_log_probs(mean, scale, actions))
    _ = jax.block_until_ready(fixed_normal_mode(mean, scale))

    print("KERNEL_OK")
</pallas_src>

<mosaic_0001>
module attributes {stable_mosaic.version = 11 : i64} {
  func.func @_diag_gaussian_equi_kernel(%arg0: i32, %arg1: memref<4x128xf32, #tpu.memory_space<vmem>>, %arg2: memref<4x128xf32, #tpu.memory_space<vmem>>) attributes {dimension_semantics = [#tpu.dimension_semantics<parallel>], iteration_bounds = array<i64: 1>, scalar_prefetch = 0 : i64, scratch_operands = 0 : i64, tpu.core_type = #tpu.core_type<tc>, window_params = [{transform_indices = @transform_0, window_bounds = array<i64: 4, 128>}, {transform_indices = @transform_1, window_bounds = array<i64: 4, 128>}]} {
    %c0 = arith.constant 0 : index
    %c0_0 = arith.constant 0 : index
    %0 = vector.load %arg1[%c0, %c0_0] : memref<4x128xf32, #tpu.memory_space<vmem>>, vector<4x128xf32>
    %1 = math.tanh %0 : vector<4x128xf32>
    %2 = tpu.iota {dimensions = array<i32: 0>} : vector<4x128xi32>
    %c2_i32 = arith.constant 2 : i32
    %3 = vector.broadcast %c2_i32 : i32 to vector<4x128xi32>
    %4 = arith.cmpi slt, %2, %3 : vector<4x128xi32>
    %5 = math.exp %1 : vector<4x128xf32>
    %6 = arith.select %4, %1, %5 : vector<4x128xi1>, vector<4x128xf32>
    %c0_1 = arith.constant 0 : index
    %c0_2 = arith.constant 0 : index
    %7 = vector.load %arg2[%c0_1, %c0_2] : memref<4x128xf32, #tpu.memory_space<vmem>>, vector<4x128xf32>
    tpu.vector_store %arg2[%c0_1, %c0_2], %6 {strides = array<i32>} : memref<4x128xf32, #tpu.memory_space<vmem>>, vector<4x128xf32>,
    return
  }
  func.func @transform_0(%arg0: i32) -> (i32, i32) {
    %c0_i32 = arith.constant 0 : i32
    %c0_i32_0 = arith.constant 0 : i32
    return %c0_i32, %arg0 : i32, i32
  }
  func.func @transform_1(%arg0: i32) -> (i32, i32) {
    %c0_i32 = arith.constant 0 : i32
    %c0_i32_0 = arith.constant 0 : i32
    return %c0_i32, %arg0 : i32, i32
  }
}

</mosaic_0001>

<bundles_post_ra>
// kernel: tpu_custom_call.1
= control target key start
LH: loop header
LB: loop body
LE: loop exit
PB: predicated region body
PF: predicated region fallthrough
CT: control target
= control target key end

     0   :  { %6 = vsyncpa [#allocation3], 0  ;;  %s135_s0 = inlined_call_operand.hbm [shape: f32[4,128], index: 0, kind: input, shape index: {}]   ;;  %s136_s1 = inlined_call_operand.hbm [shape: f32[4,128], index: 1, kind: output, shape index: {}]  }
   0x1   :  { %7 = vsyncpa [#allocation4], 0  ;;  %s99_s6 = smov [#allocation2]   ;;  %s51_s10 = scalar_lea.hbm %s135_s0, 64 }
   0x2   :  { %s14_s7 = sshll.u32 %s99_s6, 4  ;;  %p52_p0 = scmp.ne.s32.totalorder %s135_s0, %s51_s10  ;;  %s15_s7 = int_to_ptr.vmem [resolvable:$true] %s14_s7 }
   0x3   :  { %p55_p1 = scmp.lt.u32.totalorder %s51_s10, %s135_s0 }
   0x5   :  { %p57_p2 = pnand %p55_p1, %p52_p0 }
   0x7   :  { %60 = shalt.err (!%p57_p2)
}
   0x8   :  { %s61_s15 = scalar_lea.vmem %s15_s7, 64  ;;  %p66_p4 = scmp.lt.s32.totalorder %s15_s7, %s15_s7 }
   0x9   :  { %p62_p3 = scmp.ne.s32.totalorder %s15_s7, %s61_s15  ;;  %p67_p5 = scmp.lt.s32.totalorder %s61_s15, %s61_s15 }
   0xb   :  { %p68_p6 = por %p67_p5, %p66_p4 }
   0xd   :  { %p69_p7 = pnand %p68_p6, %p62_p3 }
   0xf   :  { %72 = shalt.err (!%p69_p7)
}
  0x10   :  { %17 = dma.hbm_to_vmem [thread:$0]  %s135_s0, 64, %s15_s7, [#allocation3]  }
  0x11   :  { %95 = dma.done.wait [#allocation3], 64  }
  0x12   :  { %96 = vsyncadd [#allocation3], 4294967232  ;;  %v21_v0 = vld [vmem:[#allocation2] sm:$0xf]  ;;  %v23_v3 = vlaneseq  ;;  %s100_s18 = smov [#allocation5]  }
  0x13   :  { %47 = vtanh.f32 %v21_v0  ;;  %s36_s19 = sshll.u32 %s100_s18, 4  ;;  %s37_s19 = int_to_ptr.vmem [resolvable:$true] %s36_s19 }
  0x14   :  { %v24_v4 = vshrl.u32 %v23_v3, 7  ;;  %s73_s20 = scalar_lea.vmem %s37_s19, 64  ;;  %p78_p9 = scmp.lt.s32.totalorder %s37_s19, %s37_s19 }
  0x15   :  { %p74_p8 = scmp.ne.s32.totalorder %s37_s19, %s73_s20  ;;  %p79_p10 = scmp.lt.s32.totalorder %s73_s20, %s73_s20 }
  0x16   :  { %vm25_vm0 = vcmp.lt.s32.totalorder %v24_v4, 2 }
  0x17   :  { %p80_p11 = por %p79_p10, %p78_p9 }
  0x19   :  { %p81_p12 = pnand %p80_p11, %p74_p8 }
  0x1d   :  { %v48_v1 = vpop.eup %47 }
  0x1e   :  { %v26_v2 = vmul.f32 1.442695, %v48_v1 }
  0x20   :  { %49 = vpow2.f32 %v26_v2 }
  0x2a   :  { %v50_v5 = vpop.eup %49 }
  0x2b   :  { %v28_v6 = vsel %vm25_vm0, %v48_v1, %v50_v5 }
  0x2c   :  { %29 = vst [vmem:[#allocation5] sm:$0xf] %v28_v6 }
  0x2d   :  { %84 = shalt.err (!%p81_p12)
}
  0x2e   :  { %s85_s22 = scalar_lea.hbm %s136_s1, 64 }
  0x2f   :  { %p86_p13 = scmp.ne.s32.totalorder %s136_s1, %s85_s22  ;;  %p89_p0 = scmp.lt.u32.totalorder %s85_s22, %s136_s1 }
  0x31   :  { %p91_p1 = pnand %p89_p0, %p86_p13 }
  0x33   :  { %94 = shalt.err (!%p91_p1)
}
  0x34   :  { %39 = dma.vmem_to_hbm [thread:$0]  %s37_s19, 64, %s136_s1, [#allocation4]  }
  0x35   :  { %97 = dma.done.wait [#allocation4], 64  }
  0x36   :  { %98 = vsyncadd [#allocation4], 4294967232 }
  0x37   :  { %43 = vsyncpa [#allocation3], 1 }
  0x38   :  { %44 = vsyncpa [#allocation4], 1 }

</bundles_post_ra>
